<compile_context>
chip_gen: v6e
topology: v6e:2x2x1
jax: 0.10.0
libtpu: 0.0.40
codegen_flags: <defaults>
</compile_context>

<pallas_src>
import jax
import jax.numpy as jnp
from jax.experimental import pallas as pl
from jax.experimental.pallas import tpu as pltpu


def _meanvar_kernel(x_ref, w_ref, b_ref, o_ref):
    """Fused MeanVar step for one batch tile.

    x_ref : (TB, H)      input rows
    w_ref : (H, 2*L)     [W_mean | W_var] in (in, out) layout
    b_ref : (1, 2*L)     [b_mean | b_var]
    o_ref : (TB, 2*L)    [mean | log_var]
    """
    y = jnp.dot(x_ref[...], w_ref[...], preferred_element_type=jnp.float32)
    o_ref[...] = (y + b_ref[...]).astype(o_ref.dtype)


def mean_var_forward(x, w_mean, b_mean, w_var, b_var):
    """Pallas MeanVar forward.

    x       : (B, hidden_dim)
    w_mean  : (hidden_dim, latent_dim)   (in, out) layout == nn.Linear W.T
    b_mean  : (latent_dim,)
    w_var   : (hidden_dim, latent_dim)
    b_var   : (latent_dim,)
    returns : (mean, log_var), each (B, latent_dim)
    """
    B, H = x.shape
    L = w_mean.shape[1]

    # Fuse both heads into one weight / bias so the kernel issues one matmul.
    w_cat = jnp.concatenate([w_mean, w_var], axis=1)            # (H, 2L)
    b_cat = jnp.concatenate([b_mean, b_var], axis=0).reshape(1, 2 * L)

    # Batch tiling: one grid step for small batches, 512-row tiles otherwise.
    block_b = B if B <= 512 else 512
    Bp = pl.cdiv(B, block_b) * block_b
    xp = jnp.pad(x, ((0, Bp - B), (0, 0))) if Bp != B else x

    out = pl.pallas_call(
        _meanvar_kernel,
        out_shape=jax.ShapeDtypeStruct((Bp, 2 * L), x.dtype),
        grid=(Bp // block_b,),
        in_specs=[
            pl.BlockSpec((block_b, H), lambda i: (i, 0)),
            pl.BlockSpec((H, 2 * L), lambda i: (0, 0)),
            pl.BlockSpec((1, 2 * L), lambda i: (0, 0)),
        ],
        out_specs=pl.BlockSpec((block_b, 2 * L), lambda i: (i, 0)),
        compiler_params=pltpu.CompilerParams(
            dimension_semantics=("parallel",)),
    )(xp, w_cat, b_cat)

    out = out[:B]
    return out[:, :L], out[:, L:]


def mean_var_forward_ref(x, w_mean, b_mean, w_var, b_var):
    """Pure-JAX reference (same (in, out) weight convention)."""
    mean = x @ w_mean + b_mean
    log_var = x @ w_var + b_var
    return mean, log_var


def init_meanvar_params(key, hidden_dim, latent_dim):
    """Synthetic params matching nn.Linear init, stored in (in, out) layout."""
    bound = 1.0 / jnp.sqrt(hidden_dim)
    k1, k2, k3, k4 = jax.random.split(key, 4)
    w_mean = jax.random.uniform(k1, (hidden_dim, latent_dim),
                                minval=-bound, maxval=bound, dtype=jnp.float32)
    b_mean = jax.random.uniform(k2, (latent_dim,),
                                minval=-bound, maxval=bound, dtype=jnp.float32)
    w_var = jax.random.uniform(k3, (hidden_dim, latent_dim),
                               minval=-bound, maxval=bound, dtype=jnp.float32)
    b_var = jax.random.uniform(k4, (latent_dim,),
                               minval=-bound, maxval=bound, dtype=jnp.float32)
    return w_mean, b_mean, w_var, b_var


if __name__ == "__main__":
    # Small shapes consistent with the module: batch=2, hidden_dim=32, latent_dim=16.
    B, hidden_dim, latent_dim = 2, 32, 16

    key = jax.random.PRNGKey(0)
    key, kx = jax.random.split(key)
    x = jax.random.normal(kx, (B, hidden_dim), dtype=jnp.float32)
    params = init_meanvar_params(key, hidden_dim, latent_dim)

    run = jax.jit(mean_var_forward)
    mean, log_var = run(x, *params)
    (mean, log_var) = jax.block_until_ready((mean, log_var))

    mean_ref, logvar_ref = mean_var_forward_ref(x, *params)

    assert mean.shape == (B, latent_dim)
    assert log_var.shape == (B, latent_dim)
    assert jnp.allclose(mean, mean_ref, atol=1e-5, rtol=1e-5), "mean mismatch"
    assert jnp.allclose(log_var, logvar_ref, atol=1e-5, rtol=1e-5), "log_var mismatch"
    print("KERNEL_OK")
</pallas_src>

<mosaic_0001>
module attributes {stable_mosaic.version = 11 : i64} {
  func.func @_meanvar_kernel(%arg0: i32, %arg1: memref<2x32xf32, #tpu.memory_space<vmem>>, %arg2: memref<32x32xf32, #tpu.memory_space<vmem>>, %arg3: memref<1x32xf32, #tpu.memory_space<vmem>>, %arg4: memref<2x32xf32, #tpu.memory_space<vmem>>) attributes {dimension_semantics = [#tpu.dimension_semantics<parallel>], iteration_bounds = array<i64: 1>, scalar_prefetch = 0 : i64, scratch_operands = 0 : i64, tpu.core_type = #tpu.core_type<tc>, window_params = [{transform_indices = @transform_0, window_bounds = array<i64: 2, 32>}, {pipeline_mode = #tpu.pipeline_mode<synchronous>, transform_indices = @transform_1, window_bounds = array<i64: 32, 32>}, {pipeline_mode = #tpu.pipeline_mode<synchronous>, transform_indices = @transform_2, window_bounds = array<i64: 1, 32>}, {transform_indices = @transform_3, window_bounds = array<i64: 2, 32>}]} {
    %c0 = arith.constant 0 : index
    %c0_0 = arith.constant 0 : index
    %0 = vector.load %arg1[%c0, %c0_0] : memref<2x32xf32, #tpu.memory_space<vmem>>, vector<2x32xf32>
    %c0_1 = arith.constant 0 : index
    %c0_2 = arith.constant 0 : index
    %1 = vector.load %arg2[%c0_1, %c0_2] : memref<32x32xf32, #tpu.memory_space<vmem>>, vector<32x32xf32>
    %cst = arith.constant dense<0.000000e+00> : vector<2x32xf32>
    %2 = tpu.matmul %0, %1, %cst {dimension_numbers = #tpu.dot_dimension_numbers<[1], [0], [0], [1], [0, 0, 1, 1], [], []>} : vector<2x32xf32>, vector<32x32xf32>, vector<2x32xf32> -> vector<2x32xf32>
    %c0_3 = arith.constant 0 : index
    %c0_4 = arith.constant 0 : index
    %3 = vector.load %arg3[%c0_3, %c0_4] : memref<1x32xf32, #tpu.memory_space<vmem>>, vector<1x32xf32>
    %4 = vector.broadcast %3 : vector<1x32xf32> to vector<2x32xf32>
    %5 = arith.addf %2, %4 : vector<2x32xf32>
    %c0_5 = arith.constant 0 : index
    %c0_6 = arith.constant 0 : index
    %6 = vector.load %arg4[%c0_5, %c0_6] : memref<2x32xf32, #tpu.memory_space<vmem>>, vector<2x32xf32>
    tpu.vector_store %arg4[%c0_5, %c0_6], %5 {strides = array<i32>} : memref<2x32xf32, #tpu.memory_space<vmem>>, vector<2x32xf32>,
    return
  }
  func.func @transform_0(%arg0: i32) -> (i32, i32) {
    %c0_i32 = arith.constant 0 : i32
    %c0_i32_0 = arith.constant 0 : i32
    return %arg0, %c0_i32 : i32, i32
  }
  func.func @transform_1(%arg0: i32) -> (i32, i32) {
    %c0_i32 = arith.constant 0 : i32
    %c0_i32_0 = arith.constant 0 : i32
    %c0_i32_1 = arith.constant 0 : i32
    return %c0_i32, %c0_i32_0 : i32, i32
  }
  func.func @transform_2(%arg0: i32) -> (i32, i32) {
    %c0_i32 = arith.constant 0 : i32
    %c0_i32_0 = arith.constant 0 : i32
    %c0_i32_1 = arith.constant 0 : i32
    return %c0_i32, %c0_i32_0 : i32, i32
  }
  func.func @transform_3(%arg0: i32) -> (i32, i32) {
    %c0_i32 = arith.constant 0 : i32
    %c0_i32_0 = arith.constant 0 : i32
    return %arg0, %c0_i32 : i32, i32
  }
}

</mosaic_0001>

<bundles_post_ra>
// kernel: mean_var_forward.1
= control target key start
LH: loop header
LB: loop body
LE: loop exit
PB: predicated region body
PF: predicated region fallthrough
CT: control target
= control target key end

     0   :  { %v126_v0 = vmov 0.0   ;;  %vm127_vm0 = vmmov 0   ;;  %vm26_vm1 = vcmask 261120   ;;  %vm100_vm2 = vcmask 254976   ;;  %s169_s1 = inlined_call_operand.vmem [shape: f32[32,32], index: 1, kind: input, shape index: {}]   ;;  %s170_s0 = inlined_call_operand.vmem [shape: f32[2,32], index: 0, kind: input, shape index: {}]   ;;  %s171_s2 = inlined_call_operand.vmem [shape: f32[1,32], index: 2, kind: input, shape index: {}]   ;;  %s172_s3 = inlined_call_operand.vmem [shape: f32[2,32], index: 3, kind: output, shape index: {}]  }
   0x1   :  { %113 = vmatprep.subr.mxu0 %v126_v0  ;;  %v18_v1 = vld [vmem:[%s169_s1 + $0x18] sm:$0xff]  ;;  %v17_v2 = vld [vmem:[%s169_s1 + $0x10] sm:$0xff]  ;;  %121 = vmatprep.mubr.msk.f32.mxu0 %vm127_vm0, %v126_v0  ;;  %v16_v3 = vld [vmem:[%s169_s1 + $0x8] sm:$0xff] }
   0x2   :  { %114 = vmatpush3.msra.mxu0 %v18_v1  ;;  %v15_v4 = vld [vmem:[%s169_s1] sm:$0xff] }
   0x3   :  { %115 = vmatprep.subr.mxu0 %v126_v0  ;;  %v14_v5 = vld [vmem:[%s170_s0] sm:$0x3] }
   0x4   :  { %116 = vmatpush3.msra.mxu0 %v17_v2  ;;  %v106_v6 = vld [vmem:[%s171_s2] ss:$0 sm:$0xff] }
   0x5   :  { %117 = vmatprep.subr.mxu0 %v126_v0 }
   0x6   :  { %118 = vmatpush3.msra.mxu0 %v16_v3 }
   0x7   :  { %119 = vmatprep.subr.mxu0 %v126_v0 }
   0x8   :  { %120 = vmatpush3.msra.mxu0 %v15_v4 }
   0x9   :  { %122 = vmatmul.mubr.msk.f32.vlgmr.msra.gmra.mxu0 %vm26_vm1, %v14_v5 }
  0xc9   :  { %v96_v7 = vpop.f32.mrf.mxu0 }
  0xca   :  { %v97_v8 = vadd.f32 %v106_v6, %v96_v7 }
  0xcb   :  { %v123_v9 = vpop.f32.mrf.mxu0 }
  0xcc   :  { %101 = vst.msk [vmem:[%s172_s3] sm:$0x3] %vm100_vm2, %v97_v8 }

</bundles_post_ra>
